<compile_context>
chip_gen: v6e
topology: v6e:2x2x1
jax: 0.10.0
libtpu: 0.0.40
codegen_flags: <defaults>
</compile_context>

<pallas_src>
import functools

import jax
import jax.numpy as jnp
from jax.experimental import pallas as pl
from jax.experimental.pallas import tpu as pltpu

_BN_EPS = 1e-5


def _round_up(n, m):
    return ((n + m - 1) // m) * m


# ----------------------------- fused Pallas kernel ---------------------------

def _hourglass_block_kernel(x_ref, w1_ref, wbd_ref, w3_ref, b_ref, m_ref,
                            o_ref, *, W, crp):
    """Whole residual block for one batch block, transposed lane-dense layout.

    x_ref   : (Cin, L)                 input, L = nb*H*W on lanes
    w1_ref  : (crp, Cin)               conv1 1x1 weight^T (BN scale folded, rows >= Cr zero)
    wbd_ref : (9, crp+Cout, crp+Cin)   per-tap block-diag [main conv2 | shortcut] weight^T
    w3_ref  : (Cout, crp)              conv3 1x1 weight^T
    b_ref   : (2*crp + 2*Cout, 1)      packed column biases [b1 | b2 | bs | b3]
    m_ref   : (9, 1, L)                {0,1} pad=1 validity masks per 3x3 tap
    o_ref   : (Cout, L)                output
    """
    cout = o_ref.shape[0]
    L = x_ref.shape[1]

    b1 = b_ref[0:crp, :]
    b2s = b_ref[crp:2 * crp + cout, :]           # [b2 (padded to crp) ; bs]
    b3 = b_ref[2 * crp + cout:, :]

    x = x_ref[...].astype(jnp.float32)           # (Cin, L)

    # --- main conv1 (1x1) + folded-BN bias + relu -> (crp, L); pad rows stay 0 ---
    h = jnp.maximum(
        jnp.dot(w1_ref[...], x, preferred_element_type=jnp.float32) + b1, 0.0)

    # Stack main / shortcut activations on sublanes (offset crp is 8-aligned) so
    # every 3x3 tap is ONE block-diagonal matmul instead of two.
    hx = jnp.concatenate([h, x], axis=0)         # (crp + Cin, L)

    # --- main conv2 (3x3, pad=1) and shortcut conv (3x3, pad=1), fused ----------
    # Nine shifted matmuls; the shift is a lane roll (XLU slot) plus a {0,1} mask
    # multiply, so there is no halo scratch, no zeroing, no unaligned slices.
    acc = jnp.zeros((crp + cout, L), jnp.float32)
    for dy in range(3):
        for dx in range(3):
            t = 3 * dy + dx
            off = (dy - 1) * W + (dx - 1)
            if off == 0:
                tap = hx
            else:
                tap = pltpu.roll(hx, (-off) % L, axis=1) * m_ref[t]
            acc = acc + jnp.dot(wbd_ref[t], tap,
                                preferred_element_type=jnp.float32)
    acc = acc + b2s

    h2 = jnp.maximum(acc[:crp, :], 0.0)          # main branch after conv2 (+relu)
    sc = acc[crp:, :]                            # shortcut branch (no relu)

    # --- main conv3 (1x1) + bias, residual add, final relu ----------------------
    y = jnp.dot(w3_ref[...], h2, preferred_element_type=jnp.float32) + b3 + sc
    o_ref[...] = jnp.maximum(y, 0.0).astype(o_ref.dtype)


# ------------------------------ wrapper ---------------------------------------

def hourglass_block(x_t, fp, *, n_images, H, W, images_per_step=None):
    """x_t: (Cin, N*H*W) activations (channels on sublanes, N*H*W on lanes)."""
    cin, L = x_t.shape
    crp = fp["w1t"].shape[0]
    cout = fp["w3t"].shape[0]
    HW = H * W

    nb = n_images if images_per_step is None else images_per_step
    assert n_images % nb == 0
    Lb = nb * HW
    grid = (n_images // nb,)

    # {0,1} pad=1 validity masks for the nine 3x3 taps (constant wrt inputs, same
    # for every batch block; XLA constant-folds this outside the kernel).
    pos = jnp.arange(Lb, dtype=jnp.int32)
    yy = (pos % HW) // W
    xx = pos % W
    masks = []
    for dy in range(3):
        for dx in range(3):
            masks.append((yy + dy - 1 >= 0) & (yy + dy - 1 < H) &
                         (xx + dx - 1 >= 0) & (xx + dx - 1 < W))
    mask = jnp.stack(masks).astype(x_t.dtype).reshape(9, 1, Lb)

    kernel = functools.partial(_hourglass_block_kernel, W=W, crp=crp)
    rep = lambda shape: pl.BlockSpec(shape, lambda *_: (0,) * len(shape))

    return pl.pallas_call(
        kernel,
        out_shape=jax.ShapeDtypeStruct((cout, L), x_t.dtype),
        grid=grid,
        in_specs=[
            pl.BlockSpec((cin, Lb), lambda i: (0, i)),     # activations (batch block)
            rep(fp["w1t"].shape),                          # conv1 1x1 weight^T
            rep(fp["wbd"].shape),                          # fused 3x3 block-diag weights
            rep(fp["w3t"].shape),                          # conv3 1x1 weight^T
            rep(fp["bias"].shape),                         # packed biases
            rep(mask.shape),                               # 3x3 pad masks
        ],
        out_specs=pl.BlockSpec((cout, Lb), lambda i: (0, i)),
        # TODO(synk): pltpu.CORE_PARALLEL here on v7x (with images_per_step = N // 2).
        compiler_params=pltpu.CompilerParams(dimension_semantics=("parallel",)),
    )(x_t, fp["w1t"], fp["wbd"], fp["w3t"], fp["bias"], mask)


def hourglass_resnet_forward(x_nchw, fp, images_per_step=None):
    """PyTorch-compatible NCHW in / NCHW out."""
    N, Cin, H, W = x_nchw.shape
    # Layout plumbing only: channels -> sublanes, N*H*W -> lanes (lane-dense).
    x_t = jnp.transpose(x_nchw, (1, 0, 2, 3)).reshape(Cin, N * H * W)
    y_t = hourglass_block(x_t, fp, n_images=N, H=H, W=W,
                          images_per_step=images_per_step)
    cout = y_t.shape[0]
    return jnp.transpose(y_t.reshape(cout, N, H, W), (1, 0, 2, 3))


# --------------------------- parameters / folding ------------------------------

def _init_bn(key, c):
    k1, k2, k3, k4 = jax.random.split(key, 4)
    gamma = 1.0 + 0.1 * jax.random.normal(k1, (c,), jnp.float32)
    beta = 0.1 * jax.random.normal(k2, (c,), jnp.float32)
    mean = 0.1 * jax.random.normal(k3, (c,), jnp.float32)
    var = jax.random.uniform(k4, (c,), jnp.float32, 0.5, 1.5)
    scale = gamma / jnp.sqrt(var + _BN_EPS)
    bias = beta - mean * scale
    return scale, bias


def init_params(key, channel_in, channel_out):
    cr = channel_out // 2
    ks = jax.random.split(key, 8)
    w = lambda k, kh, kw, ci, co: 0.1 * jax.random.normal(k, (kh, kw, ci, co), jnp.float32)
    p = {}
    p["w1"] = w(ks[0], 1, 1, channel_in, cr)               # ConvBNRelu 1x1
    p["s1"], p["b1"] = _init_bn(ks[1], cr)
    p["w2"] = w(ks[2], 3, 3, cr, cr)                       # ConvBNRelu 3x3 pad 1
    p["s2"], p["b2"] = _init_bn(ks[3], cr)
    p["w3"] = w(ks[4], 1, 1, cr, channel_out)              # ConvBN 1x1
    p["s3"], p["b3"] = _init_bn(ks[5], channel_out)
    p["ws"] = w(ks[6], 3, 3, channel_in, channel_out)      # shortcut ConvBN 3x3 pad 1
    p["ss"], p["bs"] = _init_bn(ks[7], channel_out)
    return p


def fold_params(p):
    """Fold BN scales into conv weights, transpose for the (C, HW) layout, pad Cr to
    a sublane tile, fuse main-conv2/shortcut into block-diagonal per-tap weights and
    pack all biases into one column vector.  Host-side, one time."""
    fold = lambda w, s: (w * s.reshape(1, 1, 1, -1)).astype(jnp.float32)
    w1 = fold(p["w1"], p["s1"])            # (1,1,Cin,Cr)
    w2 = fold(p["w2"], p["s2"])            # (3,3,Cr,Cr)
    w3 = fold(p["w3"], p["s3"])            # (1,1,Cr,Cout)
    ws = fold(p["ws"], p["ss"])            # (3,3,Cin,Cout)
    cin, cr = w1.shape[2], w1.shape[3]
    cout = w3.shape[3]
    crp = _round_up(cr, 8)                 # sublane-aligned reduced-channel count

    w1t = jnp.zeros((crp, cin), jnp.float32).at[:cr].set(w1[0, 0].T)

    wbd = jnp.zeros((9, crp + cout, crp + cin), jnp.float32)
    for dy in range(3):
        for dx in range(3):
            t = 3 * dy + dx
            wbd = wbd.at[t, :cr, :cr].set(w2[dy, dx].T)        # main conv2 block
            wbd = wbd.at[t, crp:, crp:].set(ws[dy, dx].T)      # shortcut block

    w3t = jnp.zeros((cout, crp), jnp.float32).at[:, :cr].set(w3[0, 0].T)

    def seg(v, n):
        return jnp.zeros((n,), jnp.float32).at[:v.shape[0]].set(v)

    bias = jnp.concatenate([seg(p["b1"], crp), seg(p["b2"], crp),
                            p["bs"].astype(jnp.float32),
                            p["b3"].astype(jnp.float32)]).reshape(-1, 1)
    return dict(w1t=w1t, wbd=wbd, w3t=w3t, bias=bias)


# ------------------------------ reference --------------------------------------

def _ref_conv(x, w, scale, bias, pad, relu):
    y = jax.lax.conv_general_dilated(
        x, w, (1, 1), [(pad, pad), (pad, pad)],
        dimension_numbers=("NHWC", "HWIO", "NHWC"),
        precision=jax.lax.Precision.HIGHEST)
    y = y * scale.reshape(1, 1, 1, -1) + bias.reshape(1, 1, 1, -1)
    return jnp.maximum(y, 0.0) if relu else y


def _ref_forward(x_nchw, p):
    x = jnp.transpose(x_nchw, (0, 2, 3, 1))
    h = _ref_conv(x, p["w1"], p["s1"], p["b1"], 0, True)
    h = _ref_conv(h, p["w2"], p["s2"], p["b2"], 1, True)
    h = _ref_conv(h, p["w3"], p["s3"], p["b3"], 0, False)
    sc = _ref_conv(x, p["ws"], p["ss"], p["bs"], 1, False)
    return jnp.transpose(jnp.maximum(h + sc, 0.0), (0, 3, 1, 2))


# --------------------------------- main -----------------------------------------

if __name__ == "__main__":
    key = jax.random.PRNGKey(0)
    k_param, k_x = jax.random.split(key)

    N, Cin, H, W = 2, 4, 16, 16
    Cout = 8

    params = init_params(k_param, Cin, Cout)
    folded = fold_params(params)                           # one-time host-side folding
    x = jax.random.normal(k_x, (N, Cin, H, W), jnp.float32)

    out = jax.jit(hourglass_resnet_forward)(x, folded)
    out = jax.block_until_ready(out)

    ref = _ref_forward(x, params)
    assert out.shape == (N, Cout, H, W)
    assert jnp.allclose(out, ref, atol=1e-3, rtol=1e-3), \
        float(jnp.max(jnp.abs(out - ref)))

    print("KERNEL_OK")
</pallas_src>

<mosaic_0001>
module attributes {stable_mosaic.version = 11 : i64} {
  func.func @_hourglass_block_kernel(%arg0: i32, %arg1: memref<4x512xf32, #tpu.memory_space<vmem>>, %arg2: memref<8x4xf32, #tpu.memory_space<vmem>>, %arg3: memref<9x16x12xf32, #tpu.memory_space<vmem>>, %arg4: memref<8x8xf32, #tpu.memory_space<vmem>>, %arg5: memref<32x1xf32, #tpu.memory_space<vmem>>, %arg6: memref<9x1x512xf32, #tpu.memory_space<vmem>>, %arg7: memref<8x512xf32, #tpu.memory_space<vmem>>) attributes {dimension_semantics = [#tpu.dimension_semantics<parallel>], iteration_bounds = array<i64: 1>, scalar_prefetch = 0 : i64, scratch_operands = 0 : i64, tpu.core_type = #tpu.core_type<tc>, window_params = [{transform_indices = @transform_0, window_bounds = array<i64: 4, 512>}, {pipeline_mode = #tpu.pipeline_mode<synchronous>, transform_indices = @transform_1, window_bounds = array<i64: 8, 4>}, {pipeline_mode = #tpu.pipeline_mode<synchronous>, transform_indices = @transform_2, window_bounds = array<i64: 9, 16, 12>}, {pipeline_mode = #tpu.pipeline_mode<synchronous>, transform_indices = @transform_3, window_bounds = array<i64: 8, 8>}, {pipeline_mode = #tpu.pipeline_mode<synchronous>, transform_indices = @transform_4, window_bounds = array<i64: 32, 1>}, {pipeline_mode = #tpu.pipeline_mode<synchronous>, transform_indices = @transform_5, window_bounds = array<i64: 9, 1, 512>}, {transform_indices = @transform_6, window_bounds = array<i64: 8, 512>}]} {
    %c0 = arith.constant 0 : index
    %c0_0 = arith.constant 0 : index
    %0 = vector.load %arg5[%c0, %c0_0] : memref<32x1xf32, #tpu.memory_space<vmem>>, vector<8x1xf32>
    %c8 = arith.constant 8 : index
    %c0_1 = arith.constant 0 : index
    %1 = vector.load %arg5[%c8, %c0_1] : memref<32x1xf32, #tpu.memory_space<vmem>>, vector<16x1xf32>
    %c24 = arith.constant 24 : index
    %c0_2 = arith.constant 0 : index
    %2 = vector.load %arg5[%c24, %c0_2] : memref<32x1xf32, #tpu.memory_space<vmem>>, vector<8x1xf32>
    %c0_3 = arith.constant 0 : index
    %c0_4 = arith.constant 0 : index
    %3 = vector.load %arg1[%c0_3, %c0_4] : memref<4x512xf32, #tpu.memory_space<vmem>>, vector<4x512xf32>
    %c0_5 = arith.constant 0 : index
    %c0_6 = arith.constant 0 : index
    %4 = vector.load %arg2[%c0_5, %c0_6] : memref<8x4xf32, #tpu.memory_space<vmem>>, vector<8x4xf32>
    %cst = arith.constant dense<0.000000e+00> : vector<8x512xf32>
    %5 = tpu.matmul %4, %3, %cst {dimension_numbers = #tpu.dot_dimension_numbers<[1], [0], [0], [1], [0, 0, 1, 1], [], []>} : vector<8x4xf32>, vector<4x512xf32>, vector<8x512xf32> -> vector<8x512xf32>
    %6 = vector.broadcast %0 : vector<8x1xf32> to vector<8x512xf32>
    %7 = arith.addf %5, %6 : vector<8x512xf32>
    %cst_7 = arith.constant 0.000000e+00 : f32
    %8 = vector.broadcast %cst_7 : f32 to vector<8x512xf32>
    %9 = arith.maximumf %7, %8 : vector<8x512xf32>
    %10 = tpu.concatenate %9, %3 in 0 : vector<8x512xf32>, vector<4x512xf32> -> vector<12x512xf32>
    %cst_8 = arith.constant 0.000000e+00 : f32
    %11 = vector.broadcast %cst_8 : f32 to vector<16x512xf32>
    %c17_i32 = arith.constant 17 : i32
    %12 = tpu.dynamic_rotate %10 by %c17_i32 dim 1 : vector<12x512xf32>, i32 -> vector<12x512xf32>
    %c0_9 = arith.constant 0 : index
    %c0_10 = arith.constant 0 : index
    %c0_11 = arith.constant 0 : index
    %13 = vector.load %arg6[%c0_9, %c0_10, %c0_11] : memref<9x1x512xf32, #tpu.memory_space<vmem>>, vector<1x1x512xf32>
    %14 = vector.shape_cast %13 : vector<1x1x512xf32> to vector<1x512xf32>
    %15 = vector.broadcast %14 : vector<1x512xf32> to vector<12x512xf32>
    %16 = arith.mulf %12, %15 : vector<12x512xf32>
    %c0_12 = arith.constant 0 : index
    %c0_13 = arith.constant 0 : index
    %c0_14 = arith.constant 0 : index
    %17 = vector.load %arg3[%c0_12, %c0_13, %c0_14] : memref<9x16x12xf32, #tpu.memory_space<vmem>>, vector<1x16x12xf32>
    %18 = vector.shape_cast %17 : vector<1x16x12xf32> to vector<16x12xf32>
    %cst_15 = arith.constant dense<0.000000e+00> : vector<16x512xf32>
    %19 = tpu.matmul %18, %16, %cst_15 {dimension_numbers = #tpu.dot_dimension_numbers<[1], [0], [0], [1], [0, 0, 1, 1], [], []>} : vector<16x12xf32>, vector<12x512xf32>, vector<16x512xf32> -> vector<16x512xf32>
    %20 = arith.addf %11, %19 : vector<16x512xf32>
    %c16_i32 = arith.constant 16 : i32
    %21 = tpu.dynamic_rotate %10 by %c16_i32 dim 1 : vector<12x512xf32>, i32 -> vector<12x512xf32>
    %c1 = arith.constant 1 : index
    %c0_16 = arith.constant 0 : index
    %c0_17 = arith.constant 0 : index
    %22 = vector.load %arg6[%c1, %c0_16, %c0_17] : memref<9x1x512xf32, #tpu.memory_space<vmem>>, vector<1x1x512xf32>
    %23 = vector.shape_cast %22 : vector<1x1x512xf32> to vector<1x512xf32>
    %24 = vector.broadcast %23 : vector<1x512xf32> to vector<12x512xf32>
    %25 = arith.mulf %21, %24 : vector<12x512xf32>
    %c1_18 = arith.constant 1 : index
    %c0_19 = arith.constant 0 : index
    %c0_20 = arith.constant 0 : index
    %26 = vector.load %arg3[%c1_18, %c0_19, %c0_20] : memref<9x16x12xf32, #tpu.memory_space<vmem>>, vector<1x16x12xf32>
    %27 = vector.shape_cast %26 : vector<1x16x12xf32> to vector<16x12xf32>
    %cst_21 = arith.constant dense<0.000000e+00> : vector<16x512xf32>
    %28 = tpu.matmul %27, %25, %cst_21 {dimension_numbers = #tpu.dot_dimension_numbers<[1], [0], [0], [1], [0, 0, 1, 1], [], []>} : vector<16x12xf32>, vector<12x512xf32>, vector<16x512xf32> -> vector<16x512xf32>
    %29 = arith.addf %20, %28 : vector<16x512xf32>
    %c15_i32 = arith.constant 15 : i32
    %30 = tpu.dynamic_rotate %10 by %c15_i32 dim 1 : vector<12x512xf32>, i32 -> vector<12x512xf32>
    %c2 = arith.constant 2 : index
    %c0_22 = arith.constant 0 : index
    %c0_23 = arith.constant 0 : index
    %31 = vector.load %arg6[%c2, %c0_22, %c0_23] : memref<9x1x512xf32, #tpu.memory_space<vmem>>, vector<1x1x512xf32>
    %32 = vector.shape_cast %31 : vector<1x1x512xf32> to vector<1x512xf32>
    %33 = vector.broadcast %32 : vector<1x512xf32> to vector<12x512xf32>
    %34 = arith.mulf %30, %33 : vector<12x512xf32>
    %c2_24 = arith.constant 2 : index
    %c0_25 = arith.constant 0 : index
    %c0_26 = arith.constant 0 : index
    %35 = vector.load %arg3[%c2_24, %c0_25, %c0_26] : memref<9x16x12xf32, #tpu.memory_space<vmem>>, vector<1x16x12xf32>
    %36 = vector.shape_cast %35 : vector<1x16x12xf32> to vector<16x12xf32>
    %cst_27 = arith.constant dense<0.000000e+00> : vector<16x512xf32>
    %37 = tpu.matmul %36, %34, %cst_27 {dimension_numbers = #tpu.dot_dimension_numbers<[1], [0], [0], [1], [0, 0, 1, 1], [], []>} : vector<16x12xf32>, vector<12x512xf32>, vector<16x512xf32> -> vector<16x512xf32>
    %38 = arith.addf %29, %37 : vector<16x512xf32>
    %c1_i32 = arith.constant 1 : i32
    %39 = tpu.dynamic_rotate %10 by %c1_i32 dim 1 : vector<12x512xf32>, i32 -> vector<12x512xf32>
    %c3 = arith.constant 3 : index
    %c0_28 = arith.constant 0 : index
    %c0_29 = arith.constant 0 : index
    %40 = vector.load %arg6[%c3, %c0_28, %c0_29] : memref<9x1x512xf32, #tpu.memory_space<vmem>>, vector<1x1x512xf32>
    %41 = vector.shape_cast %40 : vector<1x1x512xf32> to vector<1x512xf32>
    %42 = vector.broadcast %41 : vector<1x512xf32> to vector<12x512xf32>
    %43 = arith.mulf %39, %42 : vector<12x512xf32>
    %c3_30 = arith.constant 3 : index
    %c0_31 = arith.constant 0 : index
    %c0_32 = arith.constant 0 : index
    %44 = vector.load %arg3[%c3_30, %c0_31, %c0_32] : memref<9x16x12xf32, #tpu.memory_space<vmem>>, vector<1x16x12xf32>
    %45 = vector.shape_cast %44 : vector<1x16x12xf32> to vector<16x12xf32>
    %cst_33 = arith.constant dense<0.000000e+00> : vector<16x512xf32>
    %46 = tpu.matmul %45, %43, %cst_33 {dimension_numbers = #tpu.dot_dimension_numbers<[1], [0], [0], [1], [0, 0, 1, 1], [], []>} : vector<16x12xf32>, vector<12x512xf32>, vector<16x512xf32> -> vector<16x512xf32>
    %47 = arith.addf %38, %46 : vector<16x512xf32>
    %c4 = arith.constant 4 : index
    %c0_34 = arith.constant 0 : index
    %c0_35 = arith.constant 0 : index
    %48 = vector.load %arg3[%c4, %c0_34, %c0_35] : memref<9x16x12xf32, #tpu.memory_space<vmem>>, vector<1x16x12xf32>
    %49 = vector.shape_cast %48 : vector<1x16x12xf32> to vector<16x12xf32>
    %cst_36 = arith.constant dense<0.000000e+00> : vector<16x512xf32>
    %50 = tpu.matmul %49, %10, %cst_36 {dimension_numbers = #tpu.dot_dimension_numbers<[1], [0], [0], [1], [0, 0, 1, 1], [], []>} : vector<16x12xf32>, vector<12x512xf32>, vector<16x512xf32> -> vector<16x512xf32>
    %51 = arith.addf %47, %50 : vector<16x512xf32>
    %c511_i32 = arith.constant 511 : i32
    %52 = tpu.dynamic_rotate %10 by %c511_i32 dim 1 : vector<12x512xf32>, i32 -> vector<12x512xf32>
    %c5 = arith.constant 5 : index
    %c0_37 = arith.constant 0 : index
    %c0_38 = arith.constant 0 : index
    %53 = vector.load %arg6[%c5, %c0_37, %c0_38] : memref<9x1x512xf32, #tpu.memory_space<vmem>>, vector<1x1x512xf32>
    %54 = vector.shape_cast %53 : vector<1x1x512xf32> to vector<1x512xf32>
    %55 = vector.broadcast %54 : vector<1x512xf32> to vector<12x512xf32>
    %56 = arith.mulf %52, %55 : vector<12x512xf32>
    %c5_39 = arith.constant 5 : index
    %c0_40 = arith.constant 0 : index
    %c0_41 = arith.constant 0 : index
    %57 = vector.load %arg3[%c5_39, %c0_40, %c0_41] : memref<9x16x12xf32, #tpu.memory_space<vmem>>, vector<1x16x12xf32>
    %58 = vector.shape_cast %57 : vector<1x16x12xf32> to vector<16x12xf32>
    %cst_42 = arith.constant dense<0.000000e+00> : vector<16x512xf32>
    %59 = tpu.matmul %58, %56, %cst_42 {dimension_numbers = #tpu.dot_dimension_numbers<[1], [0], [0], [1], [0, 0, 1, 1], [], []>} : vector<16x12xf32>, vector<12x512xf32>, vector<16x512xf32> -> vector<16x512xf32>
    %60 = arith.addf %51, %59 : vector<16x512xf32>
    %c497_i32 = arith.constant 497 : i32
    %61 = tpu.dynamic_rotate %10 by %c497_i32 dim 1 : vector<12x512xf32>, i32 -> vector<12x512xf32>
    %c6 = arith.constant 6 : index
    %c0_43 = arith.constant 0 : index
    %c0_44 = arith.constant 0 : index
    %62 = vector.load %arg6[%c6, %c0_43, %c0_44] : memref<9x1x512xf32, #tpu.memory_space<vmem>>, vector<1x1x512xf32>
    %63 = vector.shape_cast %62 : vector<1x1x512xf32> to vector<1x512xf32>
    %64 = vector.broadcast %63 : vector<1x512xf32> to vector<12x512xf32>
    %65 = arith.mulf %61, %64 : vector<12x512xf32>
    %c6_45 = arith.constant 6 : index
    %c0_46 = arith.constant 0 : index
    %c0_47 = arith.constant 0 : index
    %66 = vector.load %arg3[%c6_45, %c0_46, %c0_47] : memref<9x16x12xf32, #tpu.memory_space<vmem>>, vector<1x16x12xf32>
    %67 = vector.shape_cast %66 : vector<1x16x12xf32> to vector<16x12xf32>
    %cst_48 = arith.constant dense<0.000000e+00> : vector<16x512xf32>
    %68 = tpu.matmul %67, %65, %cst_48 {dimension_numbers = #tpu.dot_dimension_numbers<[1], [0], [0], [1], [0, 0, 1, 1], [], []>} : vector<16x12xf32>, vector<12x512xf32>, vector<16x512xf32> -> vector<16x512xf32>
    %69 = arith.addf %60, %68 : vector<16x512xf32>
    %c496_i32 = arith.constant 496 : i32
    %70 = tpu.dynamic_rotate %10 by %c496_i32 dim 1 : vector<12x512xf32>, i32 -> vector<12x512xf32>
    %c7 = arith.constant 7 : index
    %c0_49 = arith.constant 0 : index
    %c0_50 = arith.constant 0 : index
    %71 = vector.load %arg6[%c7, %c0_49, %c0_50] : memref<9x1x512xf32, #tpu.memory_space<vmem>>, vector<1x1x512xf32>
    %72 = vector.shape_cast %71 : vector<1x1x512xf32> to vector<1x512xf32>
    %73 = vector.broadcast %72 : vector<1x512xf32> to vector<12x512xf32>
    %74 = arith.mulf %70, %73 : vector<12x512xf32>
    %c7_51 = arith.constant 7 : index
    %c0_52 = arith.constant 0 : index
    %c0_53 = arith.constant 0 : index
    %75 = vector.load %arg3[%c7_51, %c0_52, %c0_53] : memref<9x16x12xf32, #tpu.memory_space<vmem>>, vector<1x16x12xf32>
    %76 = vector.shape_cast %75 : vector<1x16x12xf32> to vector<16x12xf32>
    %cst_54 = arith.constant dense<0.000000e+00> : vector<16x512xf32>
    %77 = tpu.matmul %76, %74, %cst_54 {dimension_numbers = #tpu.dot_dimension_numbers<[1], [0], [0], [1], [0, 0, 1, 1], [], []>} : vector<16x12xf32>, vector<12x512xf32>, vector<16x512xf32> -> vector<16x512xf32>
    %78 = arith.addf %69, %77 : vector<16x512xf32>
    %c495_i32 = arith.constant 495 : i32
    %79 = tpu.dynamic_rotate %10 by %c495_i32 dim 1 : vector<12x512xf32>, i32 -> vector<12x512xf32>
    %c8_55 = arith.constant 8 : index
    %c0_56 = arith.constant 0 : index
    %c0_57 = arith.constant 0 : index
    %80 = vector.load %arg6[%c8_55, %c0_56, %c0_57] : memref<9x1x512xf32, #tpu.memory_space<vmem>>, vector<1x1x512xf32>
    %81 = vector.shape_cast %80 : vector<1x1x512xf32> to vector<1x512xf32>
    %82 = vector.broadcast %81 : vector<1x512xf32> to vector<12x512xf32>
    %83 = arith.mulf %79, %82 : vector<12x512xf32>
    %c8_58 = arith.constant 8 : index
    %c0_59 = arith.constant 0 : index
    %c0_60 = arith.constant 0 : index
    %84 = vector.load %arg3[%c8_58, %c0_59, %c0_60] : memref<9x16x12xf32, #tpu.memory_space<vmem>>, vector<1x16x12xf32>
    %85 = vector.shape_cast %84 : vector<1x16x12xf32> to vector<16x12xf32>
    %cst_61 = arith.constant dense<0.000000e+00> : vector<16x512xf32>
    %86 = tpu.matmul %85, %83, %cst_61 {dimension_numbers = #tpu.dot_dimension_numbers<[1], [0], [0], [1], [0, 0, 1, 1], [], []>} : vector<16x12xf32>, vector<12x512xf32>, vector<16x512xf32> -> vector<16x512xf32>
    %87 = arith.addf %78, %86 : vector<16x512xf32>
    %88 = vector.broadcast %1 : vector<16x1xf32> to vector<16x512xf32>
    %89 = arith.addf %87, %88 : vector<16x512xf32>
    %90 = vector.extract_strided_slice %89 {offsets = [0, 0], sizes = [8, 512], strides = [1, 1]} : vector<16x512xf32> to vector<8x512xf32>
    %cst_62 = arith.constant 0.000000e+00 : f32
    %91 = vector.broadcast %cst_62 : f32 to vector<8x512xf32>
    %92 = arith.maximumf %90, %91 : vector<8x512xf32>
    %93 = vector.extract_strided_slice %89 {offsets = [8, 0], sizes = [8, 512], strides = [1, 1]} : vector<16x512xf32> to vector<8x512xf32>
    %c0_63 = arith.constant 0 : index
    %c0_64 = arith.constant 0 : index
    %94 = vector.load %arg4[%c0_63, %c0_64] : memref<8x8xf32, #tpu.memory_space<vmem>>, vector<8x8xf32>
    %cst_65 = arith.constant dense<0.000000e+00> : vector<8x512xf32>
    %95 = tpu.matmul %94, %92, %cst_65 {dimension_numbers = #tpu.dot_dimension_numbers<[1], [0], [0], [1], [0, 0, 1, 1], [], []>} : vector<8x8xf32>, vector<8x512xf32>, vector<8x512xf32> -> vector<8x512xf32>
    %96 = vector.broadcast %2 : vector<8x1xf32> to vector<8x512xf32>
    %97 = arith.addf %95, %96 : vector<8x512xf32>
    %98 = arith.addf %97, %93 : vector<8x512xf32>
    %cst_66 = arith.constant 0.000000e+00 : f32
    %99 = vector.broadcast %cst_66 : f32 to vector<8x512xf32>
    %100 = arith.maximumf %98, %99 : vector<8x512xf32>
    %c0_67 = arith.constant 0 : index
    %c0_68 = arith.constant 0 : index
    %101 = vector.load %arg7[%c0_67, %c0_68] : memref<8x512xf32, #tpu.memory_space<vmem>>, vector<8x512xf32>
    tpu.vector_store %arg7[%c0_67, %c0_68], %100 {strides = array<i32>} : memref<8x512xf32, #tpu.memory_space<vmem>>, vector<8x512xf32>,
    return
  }
  func.func @transform_0(%arg0: i32) -> (i32, i32) {
    %c0_i32 = arith.constant 0 : i32
    %c0_i32_0 = arith.constant 0 : i32
    return %c0_i32, %arg0 : i32, i32
  }
  func.func @transform_1(%arg0: i32) -> (i32, i32) {
    %c0_i32 = arith.constant 0 : i32
    %c0_i32_0 = arith.constant 0 : i32
    %c0_i32_1 = arith.constant 0 : i32
    return %c0_i32, %c0_i32_0 : i32, i32
  }
  func.func @transform_2(%arg0: i32) -> (i32, i32, i32) {
    %c0_i32 = arith.constant 0 : i32
    %c0_i32_0 = arith.constant 0 : i32
    %c0_i32_1 = arith.constant 0 : i32
    %c0_i32_2 = arith.constant 0 : i32
    return %c0_i32, %c0_i32_0, %c0_i32_1 : i32, i32, i32
  }
  func.func @transform_3(%arg0: i32) -> (i32, i32) {
    %c0_i32 = arith.constant 0 : i32
    %c0_i32_0 = arith.constant 0 : i32
    %c0_i32_1 = arith.constant 0 : i32
    return %c0_i32, %c0_i32_0 : i32, i32
  }
  func.func @transform_4(%arg0: i32) -> (i32, i32) {
    %c0_i32 = arith.constant 0 : i32
    %c0_i32_0 = arith.constant 0 : i32
    %c0_i32_1 = arith.constant 0 : i32
    return %c0_i32, %c0_i32_0 : i32, i32
  }
  func.func @transform_5(%arg0: i32) -> (i32, i32, i32) {
    %c0_i32 = arith.constant 0 : i32
    %c0_i32_0 = arith.constant 0 : i32
    %c0_i32_1 = arith.constant 0 : i32
    %c0_i32_2 = arith.constant 0 : i32
    return %c0_i32, %c0_i32_0, %c0_i32_1 : i32, i32, i32
  }
  func.func @transform_6(%arg0: i32) -> (i32, i32) {
    %c0_i32 = arith.constant 0 : i32
    %c0_i32_0 = arith.constant 0 : i32
    return %c0_i32, %arg0 : i32, i32
  }
}

</mosaic_0001>

<bundles_post_ra>
// kernel: hourglass_resnet_forward.1
= control target key start
LH: loop header
LB: loop body
LE: loop exit
PB: predicated region body
PF: predicated region fallthrough
CT: control target
= control target key end

     0   :  { %vm43_vm0 = vcmask 1043456   ;;  %v2575_v2 = vmov 0.0   ;;  %v2576_v5 = vmov 0   ;;  %vm39_vm1 = vcmask 31744   ;;  %s2579_s29 = smov 15   ;;  %s2580_s30 = smov 1   ;;  %s3346_s0 = inlined_call_operand.vmem [shape: f32[4,512], index: 0, kind: input, shape index: {}]   ;;  %s3347_s1 = inlined_call_operand.vmem [shape: f32[8,4], index: 1, kind: input, shape index: {}]   ;;  %s3348_s4 = inlined_call_operand.vmem [shape: f32[32,1], index: 4, kind: input, shape index: {}]   ;;  %s3349_s5 = inlined_call_operand.vmem [shape: f32[9,1,512], index: 5, kind: input, shape index: {}]   ;;  %s3350_s2 = inlined_call_operand.vmem [shape: f32[9,16,12], index: 2, kind: input, shape index: {}]   ;;  %s3351_s3 = inlined_call_operand.vmem [shape: f32[8,8], index: 3, kind: input, shape index: {}]   ;;  %s3352_s6 = inlined_call_operand.vmem [shape: f32[8,512], index: 6, kind: output, shape index: {}]  }
   0x1   :  { %v2623_v0 = vld [vmem:[%s3346_s0] sm:$0xff]  ;;  %v2628_v1 = vld [vmem:[%s3346_s0 + $0x8] sm:$0xff]  ;;  %116 = vmatprep.mubr.f32.mxu0 %v2575_v2  ;;  %187 = vmatprep.mubr.f32.mxu1 %v2575_v2  ;;  %s2577_s0 = smov 16   ;;  %s2581_s7 = smov 127   ;;  %v216_v9 = vlaneseq  ;;  %vm318_vm7 = vcmask 97280   ;;  %vm2296_vm11 = vcmask 64512  }
   0x2   :  { %v2634_v3 = vcombine.high %v2623_v0, %v2623_v0  ;;  %v2638_v4 = vcombine.high %v2628_v1, %v2628_v1  ;;  %2571 = vset.pattern.permute.xlu0 %v2576_v5  ;;  %v23_v6 = vld [vmem:[%s3348_s4] sm:$0xff]  ;;  %269 = vrot.lane.b32.xlu1 %v2628_v1, %s2577_s0  ;;  %s2582_s8 = smov 113   ;;  %s2583_s9 = smov 112  }
   0x3   :  { %v29_v7 = vld [vmem:[%s3347_s1] sm:$0xff]  ;;  %32 = vperm.xlu0 %2571, %v23_v6   ;;  %2572 = vset.pattern.permute.xlu1 %v2576_v5  ;;  %s2578_s1 = smov 17   ;;  %v230_v12 = vshrl.u32 %v216_v9, 7  ;;  %v2714_v13 = vand.u32 127, %v216_v9  ;;  %s2584_s12 = smov 111  }
   0x4   :  { %2458 = vmatprep.subr.msk.mxu0 %vm43_vm0, %v2634_v3  ;;  %2461 = vmatprep.subr.msk.mxu1 %vm43_vm0, %v2638_v4  ;;  %v2464_v17 = vld [vmem:[%s3349_s5 + $0x4] sm:$0xf] }
   0x5   :  { %2459 = vmatpush1.msk.msra.mxu0 %vm43_vm0, %v2623_v0  ;;  %2462 = vmatpush1.msk.msra.mxu1 %vm43_vm0, %v2628_v1  ;;  %v2716_v14 = vsub.s32 3, %v230_v12  ;;  %v2718_v15 = vsub.s32 1, %v230_v12  ;;  %v2720_v16 = vsub.s32 0, %v230_v12  ;;  %v2725_v18 = vsub.s32 2, %v230_v12  ;;  %v25_v12 = vld [vmem:[%s3348_s4 + $0x10] sm:$0xff] }
   0x6   :  { %2460 = vmatmul.mubr.msk.f32.vlgmr.msra.gmra.mxu0 %vm39_vm1, %v29_v7  ;;  %2463 = vmatmul.mubr.msk.f32.vlgmr.msra.gmra.mxu1 %vm39_vm1, %v29_v7  ;;  %vm275_vm2 = vcmp.lt.s32.totalorder %v2714_v13, 16  ;;  %vm1328_vm3 = vcmp.lt.s32.totalorder %v2714_v13, 127  ;;  %vm1567_vm4 = vcmp.lt.s32.totalorder %v2714_v13, 113  ;;  %vm1806_vm5 = vcmp.lt.s32.totalorder %v2714_v13, 112 }
   0x7   :  { %261 = vrot.lane.b32.xlu0 %v2623_v0, %s2577_s0  ;;  %265 = vrot.lane.b32.xlu1 %v2634_v3, %s2577_s0  ;;  %v2729_v20 = vrot.slane %v2464_v17, %v2716_v14  ;;  %v2732_v22 = vrot.slane %v2464_v17, %v2718_v15  ;;  %v2735_v23 = vrot.slane %v2464_v17, %v2720_v16  ;;  %vm218_vm6 = vcmp.lt.s32.totalorder %v2714_v13, 17 }
   0x8   :  { %401 = vmatprep.mubr.f32.mxu0 %v2575_v2  ;;  %478 = vmatprep.mubr.f32.mxu1 %v2575_v2  ;;  %v2742_v26 = vrot.slane %v2464_v17, %v2725_v18  ;;  %v26_v17 = vld [vmem:[%s3348_s4 + $0x18] sm:$0xff]  ;;  %vm679_vm8 = vcmp.lt.s32.totalorder %v2714_v13, 15  ;;  %vm918_vm9 = vcmp.lt.s32.totalorder %v2714_v13, 1  ;;  %vm2045_vm10 = vcmp.lt.s32.totalorder %v2714_v13, 111  ;;  %v2549_v13 = vld [vmem:[%s3350_s2 + $0x80] sm:$0xff] }
   0xb   :  { %273 = vrot.lane.b32.xlu0 %v2638_v4, %s2577_s0  ;;  %202 = vrot.lane.b32.xlu1 %v2623_v0, %s2578_s1 }
   0xf   :  { %206 = vrot.lane.b32.xlu0 %v2634_v3, %s2578_s1  ;;  %210 = vrot.lane.b32.xlu1 %v2628_v1, %s2578_s1 }
  0x13   :  { %214 = vrot.lane.b32.xlu0 %v2638_v4, %s2578_s1  ;;  %665 = vrot.lane.b32.xlu1 %v2623_v0, %s2579_s29 }
  0x17   :  { %669 = vrot.lane.b32.xlu0 %v2634_v3, %s2579_s29  ;;  %673 = vrot.lane.b32.xlu1 %v2628_v1, %s2579_s29 }
  0x1b   :  { %677 = vrot.lane.b32.xlu0 %v2638_v4, %s2579_s29  ;;  %904 = vrot.lane.b32.xlu1 %v2623_v0, %s2580_s30 }
  0x1f   :  { %908 = vrot.lane.b32.xlu0 %v2634_v3, %s2580_s30  ;;  %912 = vrot.lane.b32.xlu1 %v2628_v1, %s2580_s30 }
  0x23   :  { %916 = vrot.lane.b32.xlu0 %v2638_v4, %s2580_s30  ;;  %1314 = vrot.lane.b32.xlu1 %v2623_v0, %s2581_s7 }
  0x27   :  { %1318 = vrot.lane.b32.xlu0 %v2634_v3, %s2581_s7  ;;  %1322 = vrot.lane.b32.xlu1 %v2628_v1, %s2581_s7 }
  0x2b   :  { %1326 = vrot.lane.b32.xlu0 %v2638_v4, %s2581_s7  ;;  %1553 = vrot.lane.b32.xlu1 %v2623_v0, %s2582_s8 }
  0x2f   :  { %1557 = vrot.lane.b32.xlu0 %v2634_v3, %s2582_s8  ;;  %1561 = vrot.lane.b32.xlu1 %v2628_v1, %s2582_s8 }
  0x33   :  { %1565 = vrot.lane.b32.xlu0 %v2638_v4, %s2582_s8  ;;  %1792 = vrot.lane.b32.xlu1 %v2623_v0, %s2583_s9 }
  0x37   :  { %1796 = vrot.lane.b32.xlu0 %v2634_v3, %s2583_s9  ;;  %1800 = vrot.lane.b32.xlu1 %v2628_v1, %s2583_s9 }
  0x3b   :  { %1804 = vrot.lane.b32.xlu0 %v2638_v4, %s2583_s9 }
  0x74   :  { %v270_v10 = vpop.permute.xlu1 %269 }
  0x79   :  { %v266_v19 = vpop.permute.xlu1 %265 }
  0x7a   :  { %v279_v28 = vsel %vm275_vm2, %v266_v19, %v270_v10 }
  0x7b   :  { %v313_v32 = vmul.f32 %v2742_v26, %v279_v28 }
  0x7d   :  { %v2752_v33 = vpop.permute.xlu1 %202 }
  0x7e   :  { %v2712_v8 = vpop.permute.xlu0 %32 }
  0x81   :  { %v2760_v35 = vpop.permute.xlu1 %210 }
  0x82   :  { %v262_v11 = vpop.permute.xlu0 %261 }
  0x83   :  { %v281_v29 = vsel %vm275_vm2, %v262_v11, %v266_v19 }
  0x84   :  { %v312_v31 = vmul.f32 %v2732_v22, %v281_v29 }
  0x85   :  { %v2764_v37 = vpop.permute.xlu1 %665 }
  0x86   :  { %v274_v21 = vpop.permute.xlu0 %273  ;;  %2467 = vmatprep.subr.msk.mxu0 %vm43_vm0, %v312_v31 }
  0x87   :  { %v277_v24 = vsel %vm275_vm2, %v270_v10, %v274_v21  ;;  %v283_v25 = vsel %vm275_vm2, %v274_v21, %v262_v11 }
  0x88   :  { %v314_v27 = vmul.f32 %v2729_v20, %v277_v24  ;;  %v311_v30 = vmul.f32 %v2735_v23, %v283_v25  ;;  %v227_v25 = vld [vmem:[%s3349_s5] sm:$0xf] }
  0x89   :  { %v2768_v39 = vpop.permute.xlu1 %673  ;;  %v236_v31 = vrot.slane %v227_v25, %v2718_v15 }
  0x8a   :  { %2471 = vmatprep.subr.msk.mxu1 %vm43_vm0, %v314_v27  ;;  %v2755_v34 = vpop.permute.xlu0 %206  ;;  %2468 = vmatpush1.msk.msra.mxu0 %vm43_vm0, %v311_v30 }
  0x8b   :  { %2472 = vmatpush1.msk.msra.mxu1 %vm43_vm0, %v313_v32  ;;  %v224_v32 = vsel %vm218_vm6, %v2752_v33, %v2755_v34 }
  0x8d   :  { %v2772_v41 = vpop.permute.xlu1 %904 }
  0x8e   :  { %v2762_v36 = vpop.permute.xlu0 %214 }
  0x91   :  { %v2776_v43 = vpop.permute.xlu1 %912 }
  0x92   :  { %v2766_v38 = vpop.permute.xlu0 %669 }
  0x95   :  { %v2781_v45 = vpop.permute.xlu1 %1314 }
  0x96   :  { %v2770_v40 = vpop.permute.xlu0 %677 }
  0x99   :  { %v2791_v48 = vpop.permute.xlu1 %1322 }
  0x9a   :  { %v2774_v42 = vpop.permute.xlu0 %908 }
  0x9d   :  { %v2796_v50 = vpop.permute.xlu1 %1553 }
  0x9e   :  { %v2778_v44 = vpop.permute.xlu0 %916 }
  0xa1   :  { %v2806_v53 = vpop.permute.xlu1 %1561 }
  0xa2   :  { %v2783_v46 = vpop.permute.xlu0 %1318 }
  0xa3   :  { %v2789_v47 = vsel %vm1328_vm3, %v2781_v45, %v2783_v46 }
  0xa5   :  { %v2813_v56 = vpop.permute.xlu1 %1792 }
  0xa6   :  { %v2793_v49 = vpop.permute.xlu0 %1326 }
  0xa9   :  { %v2906_v19 = vpop.permute.xlu1 %1800 }
  0xaa   :  { %v2798_v51 = vpop.permute.xlu0 %1557 }
  0xab   :  { %v2804_v52 = vsel %vm1567_vm4, %v2796_v50, %v2798_v51 }
  0xae   :  { %v2808_v54 = vpop.permute.xlu0 %1565 }
  0xb2   :  { %v2811_v55 = vpop.permute.xlu0 %1796 }
  0xb3   :  { %v2819_v57 = vsel %vm1806_vm5, %v2813_v56, %v2811_v55 }
  0xb6   :  { %v2908_v21 = vpop.permute.xlu0 %1804 }
  0xc6   :  { %v118_v58 = vpop.f32.mrf.mxu0  ;;  %v189_v59 = vpop.f32.mrf.mxu1 }
  0xc7   :  { %v119_v60 = vadd.f32 %v118_v58, %v2712_v8  ;;  %v190_v5 = vadd.f32 %v189_v59, %v2712_v8  ;;  %v232_v58 = vrot.slane %v227_v25, %v2720_v16  ;;  %v240_v59 = vrot.slane %v227_v25, %v2725_v18 }
  0xc8   :  { %v120_v61 = vpop.f32.mrf.mxu0  ;;  %v191_v62 = vpop.f32.mrf.mxu1 }
  0xc9   :  { %v2822_v63 = vmax.f32 %v119_v60, 0.0  ;;  %v121_v6 = vadd.f32 %v120_v61, %v2712_v8  ;;  %v192_v9 = vadd.f32 %v191_v62, %v2712_v8  ;;  %v2831_v10 = vmax.f32 %v190_v5, 0.0  ;;  %v24_v8 = vld [vmem:[%s3348_s4 + $0x8] sm:$0xff] }
  0xca   :  { %v244_v62 = vrot.slane %v227_v25, %v2716_v14 }
  0xcb   :  { %v2826_v7 = vmax.f32 %v121_v6, 0.0  ;;  %259 = vrot.lane.b32.xlu1 %v2822_v63, %s2577_s0  ;;  %v2835_v11 = vmax.f32 %v192_v9, 0.0  ;;  %v220_v9 = vsel %vm218_vm6, %v2760_v35, %v2762_v36 }
  0xcd   :  { %263 = vrot.lane.b32.xlu0 %v2826_v7, %s2577_s0 }
  0xcf   :  { %267 = vrot.lane.b32.xlu1 %v2831_v10, %s2577_s0 }
  0xd1   :  { %271 = vrot.lane.b32.xlu0 %v2835_v11, %s2577_s0 }
  0xd3   :  { %200 = vrot.lane.b32.xlu1 %v2822_v63, %s2578_s1 }
  0xd5   :  { %204 = vrot.lane.b32.xlu0 %v2826_v7, %s2578_s1 }
  0xd7   :  { %208 = vrot.lane.b32.xlu1 %v2831_v10, %s2578_s1 }
  0xd9   :  { %212 = vrot.lane.b32.xlu0 %v2835_v11, %s2578_s1 }
  0xdb   :  { %663 = vrot.lane.b32.xlu1 %v2822_v63, %s2579_s29 }
  0xdd   :  { %667 = vrot.lane.b32.xlu0 %v2826_v7, %s2579_s29 }
  0xdf   :  { %671 = vrot.lane.b32.xlu1 %v2831_v10, %s2579_s29 }
  0xe1   :  { %675 = vrot.lane.b32.xlu0 %v2835_v11, %s2579_s29 }
  0xe3   :  { %902 = vrot.lane.b32.xlu1 %v2822_v63, %s2580_s30 }
  0xe5   :  { %906 = vrot.lane.b32.xlu0 %v2826_v7, %s2580_s30 }
  0xe7   :  { %910 = vrot.lane.b32.xlu1 %v2831_v10, %s2580_s30 }
  0xe9   :  { %914 = vrot.lane.b32.xlu0 %v2835_v11, %s2580_s30 }
  0xeb   :  { %2031 = vrot.lane.b32.xlu1 %v2623_v0, %s2584_s12 }
  0xed   :  { %2035 = vrot.lane.b32.xlu0 %v2634_v3, %s2584_s12 }
  0xef   :  { %1312 = vrot.lane.b32.xlu1 %v2822_v63, %s2581_s7 }
  0xf1   :  { %2043 = vrot.lane.b32.xlu0 %v2638_v4, %s2584_s12 }
  0xf3   :  { %1320 = vrot.lane.b32.xlu1 %v2831_v10, %s2581_s7 }
  0xf5   :  { %1316 = vrot.lane.b32.xlu0 %v2826_v7, %s2581_s7 }
  0xf7   :  { %1551 = vrot.lane.b32.xlu1 %v2822_v63, %s2582_s8 }
  0xf9   :  { %1324 = vrot.lane.b32.xlu0 %v2835_v11, %s2581_s7 }
  0xfb   :  { %1559 = vrot.lane.b32.xlu1 %v2831_v10, %s2582_s8 }
  0xfd   :  { %1555 = vrot.lane.b32.xlu0 %v2826_v7, %s2582_s8 }
  0xff   :  { %1790 = vrot.lane.b32.xlu1 %v2822_v63, %s2583_s9 }
 0x101   :  { %1563 = vrot.lane.b32.xlu0 %v2835_v11, %s2582_s8 }
 0x103   :  { %1798 = vrot.lane.b32.xlu1 %v2831_v10, %s2583_s9 }
 0x105   :  { %1794 = vrot.lane.b32.xlu0 %v2826_v7, %s2583_s9 }
 0x107   :  { %2039 = vrot.lane.b32.xlu1 %v2628_v1, %s2584_s12 }
 0x109   :  { %1802 = vrot.lane.b32.xlu0 %v2835_v11, %s2583_s9 }
 0x10b   :  { %2029 = vrot.lane.b32.xlu1 %v2822_v63, %s2584_s12 }
 0x10d   :  { %2033 = vrot.lane.b32.xlu0 %v2826_v7, %s2584_s12 }
 0x10f   :  { %2037 = vrot.lane.b32.xlu1 %v2831_v10, %s2584_s12 }
 0x111   :  { %2041 = vrot.lane.b32.xlu0 %v2835_v11, %s2584_s12 }
 0x113   :  { %2270 = vperm.xlu1 %2572, %v24_v8  }
 0x115   :  { %2275 = vperm.xlu0 %2571, %v25_v12  }
 0x117   :  { %2293 = vperm.xlu1 %2572, %v26_v17  }
 0x13d   :  { %v260_v24 = vpop.permute.xlu1 %259 }
 0x13f   :  { %v264_v27 = vpop.permute.xlu0 %263 }
 0x140   :  { %v280_v28 = vsel %vm275_vm2, %v260_v24, %v264_v27 }
 0x141   :  { %v308_v29 = vmul.f32 %v2732_v22, %v280_v28  ;;  %v268_v30 = vpop.permute.xlu1 %267  ;;  %v226_v22 = vsel %vm218_vm6, %v2762_v36, %v2752_v33  ;;  %v2465_v33 = vld [vmem:[%s3350_s2 + $0x10] sm:$0xff]  ;;  %v256_v28 = vmul.f32 %v244_v62, %v220_v9 }
 0x142   :  { %v278_v60 = vsel %vm275_vm2, %v264_v27, %v268_v30  ;;  %v254_v27 = vmul.f32 %v236_v31, %v224_v32 }
 0x143   :  { %v272_v61 = vpop.permute.xlu0 %271  ;;  %367 = vmatprep.subr.mxu0 %v308_v29  ;;  %v309_v25 = vmul.f32 %v2742_v26, %v278_v60 }
 0x144   :  { %v276_v5 = vsel %vm275_vm2, %v268_v30, %v272_v61  ;;  %v282_v6 = vsel %vm275_vm2, %v272_v61, %v260_v24  ;;  %v222_v24 = vsel %vm218_vm6, %v2755_v34, %v2760_v35  ;;  %v2466_v30 = vld [vmem:[%s3350_s2 + $0x18] sm:$0xff] }
 0x145   :  { %v307_v8 = vmul.f32 %v2735_v23, %v282_v6  ;;  %v310_v12 = vmul.f32 %v2729_v20, %v276_v5  ;;  %v201_v17 = vpop.permute.xlu1 %200  ;;  %v2483_v23 = vld [vmem:[%s3349_s5 + $0x8] sm:$0xf]  ;;  %v253_v20 = vmul.f32 %v232_v58, %v226_v22  ;;  %v255_v34 = vmul.f32 %v240_v59, %v222_v24 }
 0x146   :  { %v698_v32 = vrot.slane %v2483_v23, %v2718_v15  ;;  %v694_v60 = vrot.slane %v2483_v23, %v2720_v16  ;;  %v706_v5 = vrot.slane %v2483_v23, %v2716_v14 }
 0x147   :  { %v205_v36 = vpop.permute.xlu0 %204  ;;  %368 = vmatpush1.msra.mxu0 %v307_v8  ;;  %444 = vmatprep.subr.mxu1 %v310_v12  ;;  %v687_v8 = vsel %vm679_vm8, %v2770_v40, %v2764_v37 }
 0x148   :  { %v223_v29 = vsel %vm218_vm6, %v201_v17, %v205_v36  ;;  %2469 = vmatmul.mubr.msk.f32.vlgmr.msra.gmra.mxu0 %vm318_vm7, %v2465_v33  ;;  %445 = vmatpush1.msra.mxu1 %v309_v25  ;;  %v257_v25 = vld [vmem:[%s3350_s2] sm:$0xff] }
 0x149   :  { %v250_v26 = vmul.f32 %v236_v31, %v223_v29  ;;  %2475 = vmatprep.subr.msk.mxu0 %vm43_vm0, %v254_v27  ;;  %2473 = vmatmul.mubr.msk.f32.vlgmr.msra.gmra.mxu1 %vm318_vm7, %v2465_v33  ;;  %v209_v35 = vpop.permute.xlu1 %208  ;;  %v685_v31 = vsel %vm679_vm8, %v2764_v37, %v2766_v38  ;;  %v681_v27 = vsel %vm679_vm8, %v2768_v39, %v2770_v40 }
 0x14a   :  { %2476 = vmatpush1.msk.msra.mxu0 %vm43_vm0, %v253_v20  ;;  %2479 = vmatprep.subr.msk.mxu1 %vm43_vm0, %v256_v28  ;;  %v221_v61 = vsel %vm218_vm6, %v205_v36, %v209_v35  ;;  %v716_v37 = vmul.f32 %v698_v32, %v685_v31  ;;  %v924_v31 = vsel %vm918_vm9, %v2772_v41, %v2774_v42 }
 0x14b   :  { %2480 = vmatpush1.msk.msra.mxu1 %vm43_vm0, %v255_v34  ;;  %v213_v22 = vpop.permute.xlu0 %212  ;;  %407 = vmatprep.mubr.f32.mxu0 %v2575_v2  ;;  %v251_v36 = vmul.f32 %v240_v59, %v221_v61  ;;  %v718_v59 = vmul.f32 %v706_v5, %v681_v27  ;;  %v258_v34 = vld [vmem:[%s3350_s2 + $0x8] sm:$0xff] }
 0x14c   :  { %v219_v6 = vsel %vm218_vm6, %v209_v35, %v213_v22  ;;  %v225_v9 = vsel %vm218_vm6, %v213_v22, %v201_v17  ;;  %539 = vmatprep.subr.mxu0 %v250_v26  ;;  %2470 = vmatmul.mubr.msk.f32.gmra.mxu0 %vm318_vm7, %v2466_v30  ;;  %v702_v17 = vrot.slane %v2483_v23, %v2725_v18 }
 0x14d   :  { %v249_v12 = vmul.f32 %v232_v58, %v225_v9  ;;  %v252_v33 = vmul.f32 %v244_v62, %v219_v6  ;;  %484 = vmatprep.mubr.f32.mxu1 %v2575_v2  ;;  %v664_v24 = vpop.permute.xlu1 %663  ;;  %573 = vmatprep.mubr.f32.mxu0 %v2575_v2  ;;  %v683_v58 = vsel %vm679_vm8, %v2766_v38, %v2768_v39  ;;  %v2494_v62 = vld [vmem:[%s3349_s5 + $0xc] sm:$0xf] }
 0x14e   :  { %2474 = vmatmul.mubr.msk.f32.gmra.mxu1 %vm318_vm7, %v2466_v30  ;;  %v715_v23 = vmul.f32 %v694_v60, %v687_v8  ;;  %v717_v39 = vmul.f32 %v702_v17, %v683_v58  ;;  %v937_v29 = vrot.slane %v2494_v62, %v2718_v15  ;;  %v933_v26 = vrot.slane %v2494_v62, %v2720_v16 }
 0x14f   :  { %v668_v20 = vpop.permute.xlu0 %667  ;;  %540 = vmatpush1.msra.mxu0 %v249_v12  ;;  %616 = vmatprep.subr.mxu1 %v252_v33  ;;  %v945_v35 = vrot.slane %v2494_v62, %v2716_v14  ;;  %v926_v6 = vsel %vm918_vm9, %v2778_v44, %v2772_v41  ;;  %v941_v33 = vrot.slane %v2494_v62, %v2725_v18  ;;  %v2484_v41 = vld [vmem:[%s3350_s2 + $0x20] sm:$0xff] }
 0x150   :  { %v684_v40 = vsel %vm679_vm8, %v664_v24, %v668_v20  ;;  %2477 = vmatmul.mubr.msk.f32.vlgmr.msra.gmra.mxu0 %vm318_vm7, %v257_v25  ;;  %617 = vmatpush1.msra.mxu1 %v251_v36  ;;  %v954_v36 = vmul.f32 %v933_v26, %v926_v6 }
 0x151   :  { %v712_v28 = vmul.f32 %v698_v32, %v684_v40  ;;  %650 = vmatprep.mubr.f32.mxu1 %v2575_v2  ;;  %2486 = vmatprep.subr.msk.mxu0 %vm43_vm0, %v716_v37  ;;  %v672_v38 = vpop.permute.xlu1 %671 }
 0x152   :  { %2481 = vmatmul.mubr.msk.f32.vlgmr.msra.gmra.mxu1 %vm318_vm7, %v257_v25  ;;  %2487 = vmatpush1.msk.msra.mxu0 %vm43_vm0, %v715_v23  ;;  %v682_v30 = vsel %vm679_vm8, %v668_v20, %v672_v38 }
 0x153   :  { %2490 = vmatprep.subr.msk.mxu1 %vm43_vm0, %v718_v59  ;;  %v676_v32 = vpop.permute.xlu0 %675  ;;  %579 = vmatprep.mubr.f32.mxu0 %v2575_v2  ;;  %v713_v25 = vmul.f32 %v702_v17, %v682_v30 }
 0x154   :  { %2491 = vmatpush1.msk.msra.mxu1 %vm43_vm0, %v717_v39  ;;  %v680_v61 = vsel %vm679_vm8, %v672_v38, %v676_v32  ;;  %v686_v22 = vsel %vm679_vm8, %v676_v32, %v664_v24  ;;  %770 = vmatprep.subr.mxu0 %v712_v28  ;;  %v920_v24 = vsel %vm918_vm9, %v2776_v43, %v2778_v44  ;;  %v2515_v39 = vld [vmem:[%s3349_s5 + $0x14] sm:$0xf] }
 0x155   :  { %v711_v9 = vmul.f32 %v694_v60, %v686_v22  ;;  %v714_v8 = vmul.f32 %v706_v5, %v680_v61  ;;  %2478 = vmatmul.mubr.msk.f32.gmra.mxu0 %vm318_vm7, %v258_v34  ;;  %656 = vmatprep.mubr.f32.mxu1 %v2575_v2  ;;  %v903_v12 = vpop.permute.xlu1 %902  ;;  %v955_v60 = vmul.f32 %v937_v29, %v924_v31 }
 0x156   :  { %2482 = vmatmul.mubr.msk.f32.gmra.mxu1 %vm318_vm7, %v258_v34  ;;  %804 = vmatprep.mubr.f32.mxu0 %v2575_v2  ;;  %v922_v5 = vsel %vm918_vm9, %v2774_v42, %v2776_v43  ;;  %v957_v17 = vmul.f32 %v945_v35, %v920_v24  ;;  %v2485_v42 = vld [vmem:[%s3350_s2 + $0x28] sm:$0xff]  ;;  %v2495_v34 = vld [vmem:[%s3350_s2 + $0x30] sm:$0xff]  ;;  %v1355_v32 = vrot.slane %v2515_v39, %v2716_v14 }
 0x157   :  { %v907_v27 = vpop.permute.xlu0 %906  ;;  %771 = vmatpush1.msra.mxu0 %v711_v9  ;;  %847 = vmatprep.subr.mxu1 %v714_v8  ;;  %v956_v62 = vmul.f32 %v941_v33, %v922_v5  ;;  %v1332_v31 = vsel %vm1328_vm3, %v2783_v46, %v2791_v48  ;;  %v1336_v61 = vsel %vm1328_vm3, %v2793_v49, %v2781_v45  ;;  %v2496_v46 = vld [vmem:[%s3350_s2 + $0x38] sm:$0xff] }
 0x158   :  { %v923_v44 = vsel %vm918_vm9, %v903_v12, %v907_v27  ;;  %848 = vmatpush1.msra.mxu1 %v713_v25  ;;  %881 = vmatprep.mubr.f32.mxu1 %v2575_v2  ;;  %v1367_v45 = vmul.f32 %v1355_v32, %v1336_v61  ;;  %v1571_v24 = vsel %vm1567_vm4, %v2798_v51, %v2806_v53 }
 0x159   :  { %v951_v37 = vmul.f32 %v937_v29, %v923_v44  ;;  %2488 = vmatmul.mubr.msk.f32.vlgmr.msra.gmra.mxu0 %vm318_vm7, %v2484_v41  ;;  %2497 = vmatprep.subr.msk.mxu0 %vm43_vm0, %v955_v60  ;;  %v911_v58 = vpop.permute.xlu1 %910 }
 0x15a   :  { %2492 = vmatmul.mubr.msk.f32.vlgmr.msra.gmra.mxu1 %vm318_vm7, %v2484_v41  ;;  %2498 = vmatpush1.msk.msra.mxu0 %vm43_vm0, %v954_v36  ;;  %v921_v43 = vsel %vm918_vm9, %v907_v27, %v911_v58  ;;  %v2506_v41 = vld [vmem:[%s3350_s2 + $0x48] sm:$0xff] }
 0x15b   :  { %2501 = vmatprep.subr.msk.mxu1 %vm43_vm0, %v957_v17  ;;  %v915_v20 = vpop.permute.xlu0 %914  ;;  %810 = vmatprep.mubr.f32.mxu0 %v2575_v2  ;;  %v952_v29 = vmul.f32 %v941_v33, %v921_v43  ;;  %v1575_v17 = vsel %vm1567_vm4, %v2808_v54, %v2796_v50  ;;  %v1569_v50 = vsel %vm1567_vm4, %v2806_v53, %v2808_v54 }
 0x15c   :  { %2502 = vmatpush1.msk.msra.mxu1 %vm43_vm0, %v956_v62  ;;  %v919_v23 = vsel %vm918_vm9, %v911_v58, %v915_v20  ;;  %v925_v40 = vsel %vm918_vm9, %v915_v20, %v903_v12  ;;  %1009 = vmatprep.subr.mxu0 %v951_v37  ;;  %v2516_v20 = vld [vmem:[%s3350_s2 + $0x50] sm:$0xff] }
 0x15d   :  { %v950_v59 = vmul.f32 %v933_v26, %v925_v40  ;;  %v953_v28 = vmul.f32 %v945_v35, %v919_v23  ;;  %2489 = vmatmul.mubr.msk.f32.gmra.mxu0 %vm318_vm7, %v2485_v42  ;;  %887 = vmatprep.mubr.f32.mxu1 %v2575_v2  ;;  %v3069_v38 = vpop.permute.xlu1 %2031  ;;  %v1347_v35 = vrot.slane %v2515_v39, %v2718_v15 }
 0x15e   :  { %2493 = vmatmul.mubr.msk.f32.gmra.mxu1 %vm318_vm7, %v2485_v42  ;;  %1043 = vmatprep.mubr.f32.mxu0 %v2575_v2  ;;  %v2537_v42 = vld [vmem:[%s3349_s5 + $0x1c] sm:$0xf] }
 0x15f   :  { %v3079_v26 = vpop.permute.xlu0 %2035  ;;  %1010 = vmatpush1.msra.mxu0 %v950_v59  ;;  %1086 = vmatprep.subr.mxu1 %v953_v28  ;;  %v1365_v22 = vmul.f32 %v1347_v35, %v1332_v31  ;;  %v1825_v53 = vrot.slane %v2537_v42, %v2718_v15  ;;  %v1833_v61 = vrot.slane %v2537_v42, %v2716_v14 }
 0x160   :  { %1087 = vmatpush1.msra.mxu1 %v952_v29  ;;  %1120 = vmatprep.mubr.f32.mxu1 %v2575_v2 }
 0x161   :  { %2499 = vmatmul.mubr.msk.f32.vlgmr.msra.gmra.mxu0 %vm318_vm7, %v2495_v34  ;;  %2507 = vmatprep.subr.msk.mxu0 %vm43_vm0, %v2634_v3  ;;  %v1313_v30 = vpop.permute.xlu1 %1312 }
 0x162   :  { %2503 = vmatmul.mubr.msk.f32.vlgmr.msra.gmra.mxu1 %vm318_vm7, %v2495_v34  ;;  %2508 = vmatpush1.msk.msra.mxu0 %vm43_vm0, %v2623_v0  ;;  %v1343_v0 = vrot.slane %v2515_v39, %v2720_v16  ;;  %v1810_v34 = vsel %vm1806_vm5, %v2811_v55, %v2906_v19  ;;  %v1821_v55 = vrot.slane %v2537_v42, %v2720_v16 }
 0x163   :  { %2511 = vmatprep.subr.msk.mxu1 %vm43_vm0, %v2638_v4  ;;  %1180 = vmatprep.subr.mxu0 %v2826_v7  ;;  %v3101_v3 = vpop.permute.xlu0 %2043  ;;  %v1351_v7 = vrot.slane %v2515_v39, %v2725_v18 }
 0x164   :  { %2512 = vmatpush1.msk.msra.mxu1 %vm43_vm0, %v2628_v1  ;;  %1049 = vmatprep.mubr.f32.mxu0 %v2575_v2  ;;  %v2526_v1 = vld [vmem:[%s3349_s5 + $0x18] sm:$0xf]  ;;  %v1364_v8 = vmul.f32 %v1343_v0, %v2789_v47 }
 0x165   :  { %1181 = vmatpush1.msra.mxu0 %v2822_v63  ;;  %1257 = vmatprep.subr.mxu1 %v2835_v11  ;;  %v1321_v4 = vpop.permute.xlu1 %1320  ;;  %v2505_v63 = vld [vmem:[%s3350_s2 + $0x40] sm:$0xff]  ;;  %v1330_v11 = vsel %vm1328_vm3, %v2791_v48, %v2793_v49  ;;  %v1586_v48 = vrot.slane %v2526_v1, %v2718_v15  ;;  %v1582_v51 = vrot.slane %v2526_v1, %v2720_v16 }
 0x166   :  { %2500 = vmatmul.mubr.msk.f32.gmra.mxu0 %vm318_vm7, %v2496_v46  ;;  %1126 = vmatprep.mubr.f32.mxu1 %v2575_v2  ;;  %v1366_v49 = vmul.f32 %v1351_v7, %v1330_v11  ;;  %v1594_v27 = vrot.slane %v2526_v1, %v2716_v14  ;;  %v1590_v62 = vrot.slane %v2526_v1, %v2725_v18 }
 0x167   :  { %1258 = vmatpush1.msra.mxu1 %v2831_v10  ;;  %2518 = vmatprep.subr.msk.mxu0 %vm43_vm0, %v1365_v22  ;;  %v1317_v6 = vpop.permute.xlu0 %1316  ;;  %v1604_v37 = vmul.f32 %v1586_v48, %v1571_v24  ;;  %v1603_v59 = vmul.f32 %v1582_v51, %v2804_v52  ;;  %v1814_v22 = vsel %vm1806_vm5, %v2908_v21, %v2813_v56  ;;  %v2527_v56 = vld [vmem:[%s3350_s2 + $0x60] sm:$0xff] }
 0x168   :  { %2504 = vmatmul.mubr.msk.f32.gmra.mxu1 %vm318_vm7, %v2496_v46  ;;  %2522 = vmatprep.subr.msk.mxu1 %vm43_vm0, %v1367_v45  ;;  %v1331_v9 = vsel %vm1328_vm3, %v1317_v6, %v1321_v4  ;;  %v1333_v10 = vsel %vm1328_vm3, %v1313_v30, %v1317_v6  ;;  %v1606_v28 = vmul.f32 %v1594_v27, %v1575_v17  ;;  %v2548_v6 = vld [vmem:[%s3349_s5 + $0x20] sm:$0xf] }
 0x169   :  { %v1361_v12 = vmul.f32 %v1347_v35, %v1331_v9  ;;  %1214 = vmatprep.mubr.f32.mxu0 %v2575_v2  ;;  %1291 = vmatprep.mubr.f32.mxu1 %v2575_v2  ;;  %v1552_v33 = vpop.permute.xlu1 %1551  ;;  %v1360_v25 = vmul.f32 %v1343_v0, %v1333_v10  ;;  %v1605_v54 = vmul.f32 %v1590_v62, %v1569_v50 }
 0x16a   :  { %2509 = vmatmul.mubr.msk.f32.vlgmr.msra.gmra.mxu0 %vm318_vm7, %v2505_v63  ;;  %v1808_v1 = vsel %vm1806_vm5, %v2906_v19, %v2908_v21  ;;  %v2064_v21 = vrot.slane %v2548_v6, %v2718_v15  ;;  %v1842_v9 = vmul.f32 %v1821_v55, %v2819_v57  ;;  %v1845_v10 = vmul.f32 %v1833_v61, %v1814_v22  ;;  %v2528_v57 = vld [vmem:[%s3350_s2 + $0x68] sm:$0xff] }
 0x16b   :  { %2519 = vmatpush1.msk.msra.mxu0 %vm43_vm0, %v1364_v8  ;;  %v1325_v47 = vpop.permute.xlu0 %1324  ;;  %1220 = vmatprep.mubr.f32.mxu0 %v2575_v2 }
 0x16c   :  { %2513 = vmatmul.mubr.msk.f32.vlgmr.msra.gmra.mxu1 %vm318_vm7, %v2505_v63  ;;  %v1329_v60 = vsel %vm1328_vm3, %v1321_v4, %v1325_v47  ;;  %v1335_v5 = vsel %vm1328_vm3, %v1325_v47, %v1313_v30  ;;  %1419 = vmatprep.subr.mxu0 %v1361_v12  ;;  %v2517_v30 = vld [vmem:[%s3350_s2 + $0x58] sm:$0xff]  ;;  %v1843_v4 = vmul.f32 %v1825_v53, %v1810_v34 }
 0x16d   :  { %2523 = vmatpush1.msk.msra.mxu1 %vm43_vm0, %v1366_v49  ;;  %v1363_v36 = vmul.f32 %v1355_v32, %v1335_v5  ;;  %1297 = vmatprep.mubr.f32.mxu1 %v2575_v2  ;;  %v1560_v44 = vpop.permute.xlu1 %1559  ;;  %v1362_v58 = vmul.f32 %v1351_v7, %v1329_v60  ;;  %v1829_v7 = vrot.slane %v2537_v42, %v2725_v18 }
 0x16e   :  { %2510 = vmatmul.mubr.msk.f32.gmra.mxu0 %vm318_vm7, %v2506_v41  ;;  %v2072_v60 = vrot.slane %v2548_v6, %v2716_v14  ;;  %v2068_v14 = vrot.slane %v2548_v6, %v2725_v18 }
 0x16f   :  { %1420 = vmatpush1.msra.mxu0 %v1360_v25  ;;  %v1556_v43 = vpop.permute.xlu0 %1555  ;;  %1453 = vmatprep.mubr.f32.mxu0 %v2575_v2 }
 0x170   :  { %2514 = vmatmul.mubr.msk.f32.gmra.mxu1 %vm318_vm7, %v2506_v41  ;;  %2529 = vmatprep.subr.msk.mxu0 %vm43_vm0, %v1604_v37  ;;  %v1570_v23 = vsel %vm1567_vm4, %v1556_v43, %v1560_v44  ;;  %v1572_v40 = vsel %vm1567_vm4, %v1552_v33, %v1556_v43  ;;  %v2060_v41 = vrot.slane %v2548_v6, %v2720_v16 }
 0x171   :  { %v1600_v39 = vmul.f32 %v1586_v48, %v1570_v23  ;;  %1496 = vmatprep.subr.mxu1 %v1363_v36  ;;  %1530 = vmatprep.mubr.f32.mxu1 %v2575_v2  ;;  %v1791_v29 = vpop.permute.xlu1 %1790  ;;  %v1599_v35 = vmul.f32 %v1582_v51, %v1572_v40  ;;  %v1844_v48 = vmul.f32 %v1829_v7, %v1808_v1 }
 0x172   :  { %2520 = vmatmul.mubr.msk.f32.vlgmr.msra.gmra.mxu0 %vm318_vm7, %v2516_v20  ;;  %1497 = vmatpush1.msra.mxu1 %v1362_v58  ;;  %v2053_v36 = vsel %vm2045_vm10, %v3101_v3, %v3069_v38 }
 0x173   :  { %2530 = vmatpush1.msk.msra.mxu0 %vm43_vm0, %v1603_v59  ;;  %2533 = vmatprep.subr.msk.mxu1 %vm43_vm0, %v1606_v28  ;;  %v1564_v52 = vpop.permute.xlu0 %1563  ;;  %v2084_v37 = vmul.f32 %v2072_v60, %v2053_v36 }
 0x174   :  { %2524 = vmatmul.mubr.msk.f32.vlgmr.msra.gmra.mxu1 %vm318_vm7, %v2516_v20  ;;  %v1568_v32 = vsel %vm1567_vm4, %v1560_v44, %v1564_v52  ;;  %v1574_v31 = vsel %vm1567_vm4, %v1564_v52, %v1552_v33  ;;  %1459 = vmatprep.mubr.f32.mxu0 %v2575_v2  ;;  %v2539_v20 = vld [vmem:[%s3350_s2 + $0x78] sm:$0xff] }
 0x175   :  { %2534 = vmatpush1.msk.msra.mxu1 %vm43_vm0, %v1605_v54  ;;  %v1602_v46 = vmul.f32 %v1594_v27, %v1574_v31  ;;  %1658 = vmatprep.subr.mxu0 %v1600_v39  ;;  %v1799_v0 = vpop.permute.xlu1 %1798  ;;  %v1601_v45 = vmul.f32 %v1590_v62, %v1568_v32  ;;  %v2051_v27 = vsel %vm2045_vm10, %v3069_v38, %v3079_v26  ;;  %v2550_v39 = vld [vmem:[%s3350_s2 + $0x88] sm:$0xff] }
 0x176   :  { %2521 = vmatmul.mubr.msk.f32.gmra.mxu0 %vm318_vm7, %v2517_v30  ;;  %1536 = vmatprep.mubr.f32.mxu1 %v2575_v2  ;;  %v2081_v38 = vmul.f32 %v2060_v41, %v2051_v27 }
 0x177   :  { %1659 = vmatpush1.msra.mxu0 %v1599_v35  ;;  %v1795_v63 = vpop.permute.xlu0 %1794  ;;  %1692 = vmatprep.mubr.f32.mxu0 %v2575_v2 }
 0x178   :  { %2525 = vmatmul.mubr.msk.f32.gmra.mxu1 %vm318_vm7, %v2517_v30  ;;  %2540 = vmatprep.subr.msk.mxu0 %vm43_vm0, %v1843_v4  ;;  %v1809_v11 = vsel %vm1806_vm5, %v1795_v63, %v1799_v0  ;;  %v1811_v19 = vsel %vm1806_vm5, %v1791_v29, %v1795_v63 }
 0x179   :  { %v1839_v8 = vmul.f32 %v1825_v53, %v1809_v11  ;;  %1735 = vmatprep.subr.mxu1 %v1602_v46  ;;  %1769 = vmatprep.mubr.f32.mxu1 %v2575_v2  ;;  %v2040_v12 = vpop.permute.xlu1 %2039  ;;  %v1838_v49 = vmul.f32 %v1821_v55, %v1811_v19 }
 0x17a   :  { %2531 = vmatmul.mubr.msk.f32.vlgmr.msra.gmra.mxu0 %vm318_vm7, %v2527_v56  ;;  %1736 = vmatpush1.msra.mxu1 %v1601_v45  ;;  %v2049_v33 = vsel %vm2045_vm10, %v3079_v26, %v2040_v12  ;;  %v2538_v26 = vld [vmem:[%s3350_s2 + $0x70] sm:$0xff]  ;;  %v2047_v17 = vsel %vm2045_vm10, %v2040_v12, %v3101_v3 }
 0x17b   :  { %2541 = vmatpush1.msk.msra.mxu0 %vm43_vm0, %v1842_v9  ;;  %2544 = vmatprep.subr.msk.mxu1 %vm43_vm0, %v1845_v10  ;;  %v1803_v15 = vpop.permute.xlu0 %1802  ;;  %v2082_v24 = vmul.f32 %v2064_v21, %v2049_v33  ;;  %v2083_v3 = vmul.f32 %v2068_v14, %v2047_v17 }
 0x17c   :  { %2535 = vmatmul.mubr.msk.f32.vlgmr.msra.gmra.mxu1 %vm318_vm7, %v2527_v56  ;;  %v1807_v25 = vsel %vm1806_vm5, %v1799_v0, %v1803_v15  ;;  %v1813_v47 = vsel %vm1806_vm5, %v1803_v15, %v1791_v29  ;;  %1698 = vmatprep.mubr.f32.mxu0 %v2575_v2 }
 0x17d   :  { %2545 = vmatpush1.msk.msra.mxu1 %vm43_vm0, %v1844_v48  ;;  %v1841_v5 = vmul.f32 %v1833_v61, %v1813_v47  ;;  %1897 = vmatprep.subr.mxu0 %v1839_v8  ;;  %v2030_v51 = vpop.permute.xlu1 %2029  ;;  %v1840_v44 = vmul.f32 %v1829_v7, %v1807_v25 }
 0x17e   :  { %2532 = vmatmul.mubr.msk.f32.gmra.mxu0 %vm318_vm7, %v2528_v57  ;;  %1775 = vmatprep.mubr.f32.mxu1 %v2575_v2 }
 0x17f   :  { %1898 = vmatpush1.msra.mxu0 %v1838_v49  ;;  %v2034_v16 = vpop.permute.xlu0 %2033  ;;  %1931 = vmatprep.mubr.f32.mxu0 %v2575_v2 }
 0x180   :  { %2536 = vmatmul.mubr.msk.f32.gmra.mxu1 %vm318_vm7, %v2528_v57  ;;  %2551 = vmatprep.subr.msk.mxu0 %vm43_vm0, %v2082_v24  ;;  %v2050_v58 = vsel %vm2045_vm10, %v2030_v51, %v2034_v16 }
 0x181   :  { %1974 = vmatprep.subr.mxu1 %v1841_v5  ;;  %2008 = vmatprep.mubr.f32.mxu1 %v2575_v2  ;;  %v2038_v18 = vpop.permute.xlu1 %2037  ;;  %v2077_v40 = vmul.f32 %v2060_v41, %v2050_v58 }
 0x182   :  { %2542 = vmatmul.mubr.msk.f32.vlgmr.msra.gmra.mxu0 %vm318_vm7, %v2538_v26  ;;  %1975 = vmatpush1.msra.mxu1 %v1840_v44  ;;  %v2048_v62 = vsel %vm2045_vm10, %v2034_v16, %v2038_v18 }
 0x183   :  { %2552 = vmatpush1.msk.msra.mxu0 %vm43_vm0, %v2081_v38  ;;  %2555 = vmatprep.subr.msk.mxu1 %vm43_vm0, %v2084_v37  ;;  %v2078_v42 = vmul.f32 %v2064_v21, %v2048_v62  ;;  %v2042_v43 = vpop.permute.xlu0 %2041 }
 0x184   :  { %2546 = vmatmul.mubr.msk.f32.vlgmr.msra.gmra.mxu1 %vm318_vm7, %v2538_v26  ;;  %v2046_v50 = vsel %vm2045_vm10, %v2038_v18, %v2042_v43  ;;  %v2052_v23 = vsel %vm2045_vm10, %v2042_v43, %v2030_v51  ;;  %1937 = vmatprep.mubr.f32.mxu0 %v2575_v2 }
 0x185   :  { %2556 = vmatpush1.msk.msra.mxu1 %vm43_vm0, %v2083_v3  ;;  %v2079_v59 = vmul.f32 %v2068_v14, %v2046_v50  ;;  %v2080_v28 = vmul.f32 %v2072_v60, %v2052_v23  ;;  %2014 = vmatprep.mubr.f32.mxu1 %v2575_v2 }
 0x186   :  { %2543 = vmatmul.mubr.msk.f32.gmra.mxu0 %vm318_vm7, %v2539_v20  ;;  %2136 = vmatprep.subr.mxu0 %v2078_v42 }
 0x187   :  { %2137 = vmatpush1.msra.mxu0 %v2077_v40  ;;  %2170 = vmatprep.mubr.f32.mxu0 %v2575_v2 }
 0x188   :  { %2547 = vmatmul.mubr.msk.f32.gmra.mxu1 %vm318_vm7, %v2539_v20  ;;  %2213 = vmatprep.subr.mxu1 %v2080_v28 }
 0x189   :  { %2214 = vmatpush1.msra.mxu1 %v2079_v59  ;;  %2247 = vmatprep.mubr.f32.mxu1 %v2575_v2 }
 0x18a   :  { %2553 = vmatmul.mubr.msk.f32.vlgmr.msra.gmra.mxu0 %vm318_vm7, %v2549_v13 }
 0x18b   :  { %2176 = vmatprep.mubr.f32.mxu0 %v2575_v2 }
 0x18c   :  { %2557 = vmatmul.mubr.msk.f32.vlgmr.msra.gmra.mxu1 %vm318_vm7, %v2549_v13 }
 0x18d   :  { %2253 = vmatprep.mubr.f32.mxu1 %v2575_v2 }
 0x18e   :  { %2554 = vmatmul.mubr.msk.f32.gmra.mxu0 %vm318_vm7, %v2550_v39 }
 0x18f   :  { %2364 = vmatprep.mubr.f32.mxu0 %v2575_v2 }
 0x190   :  { %2558 = vmatmul.mubr.msk.f32.gmra.mxu1 %vm318_vm7, %v2550_v39 }
 0x191   :  { %2435 = vmatprep.mubr.f32.mxu1 %v2575_v2 }
 0x208   :  { %v3304_v29 = vpop.f32.mrf.mxu0 }
 0x209   :  { %v3306_v53 = vpop.f32.mrf.mxu1 }
 0x20a   :  { %v3308_v54 = vpop.f32.mrf.mxu0 }
 0x20b   :  { %v3310_v34 = vpop.f32.mrf.mxu1 }
 0x20c   :  { %v409_v35 = vpop.f32.mrf.mxu0 }
 0x20e   :  { %v486_v52 = vpop.f32.mrf.mxu1  ;;  %v411_v30 = vpop.f32.mrf.mxu0 }
 0x210   :  { %v488_v32 = vpop.f32.mrf.mxu1  ;;  %v3312_v31 = vpop.f32.mrf.mxu0 }
 0x212   :  { %v3314_v55 = vpop.f32.mrf.mxu1  ;;  %v3316_v61 = vpop.f32.mrf.mxu0 }
 0x214   :  { %v3318_v46 = vpop.f32.mrf.mxu1 }
 0x215   :  { %v581_v2 = vpop.f32.mrf.mxu0 }
 0x216   :  { %v582_v0 = vadd.f32 %v581_v2, %v409_v35  ;;  %v658_v22 = vpop.f32.mrf.mxu1 }
 0x217   :  { %v659_v4 = vadd.f32 %v658_v22, %v486_v52  ;;  %v583_v45 = vpop.f32.mrf.mxu0 }
 0x218   :  { %v584_v7 = vadd.f32 %v583_v45, %v411_v30  ;;  %v660_v1 = vpop.f32.mrf.mxu1  ;;  %v653_v45 = vadd.f32 %v3314_v55, %v3306_v53 }
 0x219   :  { %v661_v6 = vadd.f32 %v660_v1, %v488_v32  ;;  %v806_v63 = vpop.f32.mrf.mxu0 }
 0x21a   :  { %v883_v56 = vpop.f32.mrf.mxu1 }
 0x21b   :  { %v808_v11 = vpop.f32.mrf.mxu0 }
 0x21c   :  { %v3320_v19 = vpop.f32.mrf.mxu1 }
 0x21d   :  { %v812_v21 = vpop.f32.mrf.mxu0 }
 0x21e   :  { %v898_v9 = vadd.f32 %v812_v21, %v582_v0  ;;  %v889_v10 = vpop.f32.mrf.mxu1 }
 0x21f   :  { %v900_v8 = vadd.f32 %v889_v10, %v659_v4  ;;  %v814_v12 = vpop.f32.mrf.mxu0  ;;  %v576_v4 = vadd.f32 %v3312_v31, %v3304_v29  ;;  %v655_v10 = vadd.f32 %v3318_v46, %v3310_v34 }
 0x220   :  { %v899_v33 = vadd.f32 %v814_v12, %v584_v7  ;;  %v891_v48 = vpop.f32.mrf.mxu1 }
 0x221   :  { %v901_v49 = vadd.f32 %v891_v48, %v661_v6  ;;  %v1045_v15 = vpop.f32.mrf.mxu0  ;;  %v578_v6 = vadd.f32 %v3316_v61, %v3308_v54  ;;  %v894_v21 = vadd.f32 %v806_v63, %v576_v4  ;;  %v897_v31 = vadd.f32 %v3320_v19, %v655_v10  ;;  %v2290_v4 = vld [vmem:[%s3351_s3] sm:$0xff] }
 0x222   :  { %v1122_v57 = vpop.f32.mrf.mxu1 }
 0x223   :  { %v1047_v24 = vpop.f32.mrf.mxu0  ;;  %v895_v48 = vadd.f32 %v808_v11, %v578_v6 }
 0x224   :  { %v1124_v25 = vpop.f32.mrf.mxu1 }
 0x225   :  { %v1136_v61 = vadd.f32 %v1124_v25, %v897_v31 }
 0x226   :  { %v1051_v47 = vpop.f32.mrf.mxu0 }
 0x227   :  { %v1137_v41 = vadd.f32 %v1051_v47, %v898_v9 }
 0x228   :  { %v1128_v60 = vpop.f32.mrf.mxu1  ;;  %v1053_v5 = vpop.f32.mrf.mxu0 }
 0x229   :  { %v1139_v51 = vadd.f32 %v1128_v60, %v900_v8  ;;  %v1138_v27 = vadd.f32 %v1053_v5, %v899_v33  ;;  %v896_v8 = vadd.f32 %v883_v56, %v653_v45  ;;  %v1134_v60 = vadd.f32 %v1047_v24, %v895_v48 }
 0x22a   :  { %v1130_v36 = vpop.f32.mrf.mxu1  ;;  %v1216_v44 = vpop.f32.mrf.mxu0 }
 0x22b   :  { %v1140_v14 = vadd.f32 %v1130_v36, %v901_v49  ;;  %v1133_v49 = vadd.f32 %v1045_v15, %v894_v21  ;;  %v1135_v53 = vadd.f32 %v1122_v57, %v896_v8 }
 0x22c   :  { %v1293_v16 = vpop.f32.mrf.mxu1  ;;  %v1218_v26 = vpop.f32.mrf.mxu0 }
 0x22d   :  { %v1304_v5 = vadd.f32 %v1216_v44, %v1133_v49  ;;  %v1306_v63 = vadd.f32 %v1293_v16, %v1135_v53  ;;  %v1305_v34 = vadd.f32 %v1218_v26, %v1134_v60 }
 0x22e   :  { %v1295_v17 = vpop.f32.mrf.mxu1  ;;  %v1222_v38 = vpop.f32.mrf.mxu0 }
 0x22f   :  { %v1308_v37 = vadd.f32 %v1222_v38, %v1137_v41  ;;  %v1307_v56 = vadd.f32 %v1295_v17, %v1136_v61 }
 0x230   :  { %v1299_v18 = vpop.f32.mrf.mxu1  ;;  %v1224_v58 = vpop.f32.mrf.mxu0 }
 0x231   :  { %v1310_v62 = vadd.f32 %v1299_v18, %v1139_v51  ;;  %v1309_v3 = vadd.f32 %v1224_v58, %v1138_v27 }
 0x232   :  { %v1301_v42 = vpop.f32.mrf.mxu1  ;;  %v1455_v43 = vpop.f32.mrf.mxu0 }
 0x233   :  { %v1311_v20 = vadd.f32 %v1301_v42, %v1140_v14  ;;  %v1543_v46 = vadd.f32 %v1455_v43, %v1304_v5 }
 0x234   :  { %v1532_v50 = vpop.f32.mrf.mxu1  ;;  %v1457_v23 = vpop.f32.mrf.mxu0 }
 0x235   :  { %v1545_v36 = vadd.f32 %v1532_v50, %v1306_v63  ;;  %v1544_v14 = vadd.f32 %v1457_v23, %v1305_v34  ;;  %v2271_v50 = vpop.permute.xlu1 %2270 }
 0x236   :  { %v1534_v40 = vpop.f32.mrf.mxu1  ;;  %v1461_v59 = vpop.f32.mrf.mxu0 }
 0x237   :  { %v1547_v28 = vadd.f32 %v1461_v59, %v1308_v37  ;;  %v1546_v19 = vadd.f32 %v1534_v40, %v1307_v56 }
 0x238   :  { %v1538_v13 = vpop.f32.mrf.mxu1  ;;  %v1463_v39 = vpop.f32.mrf.mxu0 }
 0x239   :  { %v1549_v35 = vadd.f32 %v1538_v13, %v1310_v62  ;;  %v1548_v52 = vadd.f32 %v1463_v39, %v1309_v3  ;;  %v2294_v48 = vpop.permute.xlu1 %2293 }
 0x23a   :  { %v1540_v30 = vpop.f32.mrf.mxu1  ;;  %v1694_v32 = vpop.f32.mrf.mxu0 }
 0x23b   :  { %v1550_v2 = vadd.f32 %v1540_v30, %v1311_v20  ;;  %v1782_v38 = vadd.f32 %v1694_v32, %v1543_v46 }
 0x23c   :  { %v1771_v0 = vpop.f32.mrf.mxu1  ;;  %v1696_v22 = vpop.f32.mrf.mxu0 }
 0x23d   :  { %v1784_v57 = vadd.f32 %v1771_v0, %v1545_v36  ;;  %v1783_v24 = vadd.f32 %v1696_v22, %v1544_v14 }
 0x23e   :  { %v1773_v7 = vpop.f32.mrf.mxu1  ;;  %v1700_v1 = vpop.f32.mrf.mxu0 }
 0x23f   :  { %v1786_v9 = vadd.f32 %v1700_v1, %v1547_v28  ;;  %v1785_v16 = vadd.f32 %v1773_v7, %v1546_v19 }
 0x240   :  { %v1777_v12 = vpop.f32.mrf.mxu1  ;;  %v1702_v33 = vpop.f32.mrf.mxu0 }
 0x241   :  { %v1788_v47 = vadd.f32 %v1777_v12, %v1549_v35  ;;  %v1787_v29 = vadd.f32 %v1702_v33, %v1548_v52  ;;  %v2276_v12 = vpop.permute.xlu0 %2275 }
 0x242   :  { %v1779_v55 = vpop.f32.mrf.mxu1  ;;  %v1933_v41 = vpop.f32.mrf.mxu0 }
 0x243   :  { %v1789_v54 = vadd.f32 %v1779_v55, %v1550_v2  ;;  %v2021_v44 = vadd.f32 %v1933_v41, %v1782_v38 }
 0x244   :  { %v2010_v51 = vpop.f32.mrf.mxu1  ;;  %v1935_v27 = vpop.f32.mrf.mxu0 }
 0x245   :  { %v2023_v26 = vadd.f32 %v2010_v51, %v1784_v57  ;;  %v2022_v43 = vadd.f32 %v1935_v27, %v1783_v24 }
 0x246   :  { %v2012_v11 = vpop.f32.mrf.mxu1  ;;  %v1939_v15 = vpop.f32.mrf.mxu0 }
 0x247   :  { %v2025_v37 = vadd.f32 %v1939_v15, %v1786_v9  ;;  %v2024_v28 = vadd.f32 %v2012_v11, %v1785_v16 }
 0x248   :  { %v2016_v18 = vpop.f32.mrf.mxu1  ;;  %v1941_v58 = vpop.f32.mrf.mxu0 }
 0x249   :  { %v2027_v62 = vadd.f32 %v2016_v18, %v1788_v47  ;;  %v2026_v25 = vadd.f32 %v1941_v58, %v1787_v29 }
 0x24a   :  { %v2018_v3 = vpop.f32.mrf.mxu1  ;;  %v2172_v42 = vpop.f32.mrf.mxu0 }
 0x24b   :  { %v2028_v17 = vadd.f32 %v2018_v3, %v1789_v54  ;;  %v2260_v20 = vadd.f32 %v2172_v42, %v2021_v44 }
 0x24c   :  { %v2249_v59 = vpop.f32.mrf.mxu1  ;;  %v2174_v23 = vpop.f32.mrf.mxu0 }
 0x24d   :  { %v2262_v13 = vadd.f32 %v2249_v59, %v2023_v26  ;;  %v2261_v40 = vadd.f32 %v2174_v23, %v2022_v43  ;;  %v2278_v39 = vadd.f32 %v2271_v50, %v2260_v20 }
 0x24e   :  { %v2251_v35 = vpop.f32.mrf.mxu1  ;;  %v2178_v1 = vpop.f32.mrf.mxu0 }
 0x24f   :  { %v2279_v52 = vadd.f32 %v2271_v50, %v2261_v40  ;;  %v2263_v30 = vadd.f32 %v2251_v35, %v2024_v28  ;;  %v2280_v32 = vadd.f32 %v2271_v50, %v2262_v13  ;;  %v2286_v22 = vmax.f32 %v2278_v39, 0.0 }
 0x250   :  { %v2255_v6 = vpop.f32.mrf.mxu1  ;;  %v2180_v21 = vpop.f32.mrf.mxu0  ;;  %v2264_v9 = vadd.f32 %v2178_v1, %v2025_v37 }
 0x251   :  { %v2287_v2 = vmax.f32 %v2279_v52, 0.0  ;;  %v2281_v0 = vadd.f32 %v2271_v50, %v2263_v30  ;;  %v2288_v7 = vmax.f32 %v2280_v32, 0.0  ;;  %v2266_v8 = vadd.f32 %v2255_v6, %v2027_v62 }
 0x252   :  { %v2257_v10 = vpop.f32.mrf.mxu1  ;;  %v2265_v33 = vadd.f32 %v2180_v21, %v2026_v25  ;;  %v2282_v29 = vadd.f32 %v2276_v12, %v2264_v9 }
 0x253   :  { %v2289_v45 = vmax.f32 %v2281_v0, 0.0  ;;  %2330 = vmatprep.subr.mxu0 %v2287_v2  ;;  %v2267_v49 = vadd.f32 %v2257_v10, %v2028_v17  ;;  %v2284_v53 = vadd.f32 %v2276_v12, %v2266_v8 }
 0x254   :  { %2331 = vmatpush1.msra.mxu0 %v2286_v22  ;;  %v2283_v60 = vadd.f32 %v2276_v12, %v2265_v33 }
 0x255   :  { %2401 = vmatprep.subr.mxu1 %v2289_v45  ;;  %2559 = vmatmul.mubr.msk.f32.vlgmr.msra.gmra.mxu0 %vm2296_vm11, %v2290_v4  ;;  %v2285_v63 = vadd.f32 %v2276_v12, %v2267_v49 }
 0x256   :  { %2402 = vmatpush1.msra.mxu1 %v2288_v7 }
 0x257   :  { %2560 = vmatmul.mubr.msk.f32.vlgmr.msra.gmra.mxu1 %vm2296_vm11, %v2290_v4 }
 0x315   :  { %v2366_v47 = vpop.f32.mrf.mxu0 }
 0x316   :  { %v2367_v31 = vadd.f32 %v2366_v47, %v2294_v48 }
 0x317   :  { %v2437_v55 = vpop.f32.mrf.mxu1  ;;  %v2368_v41 = vpop.f32.mrf.mxu0 }
 0x318   :  { %v2442_v5 = vadd.f32 %v2367_v31, %v2282_v29  ;;  %v2438_v54 = vadd.f32 %v2437_v55, %v2294_v48  ;;  %v2369_v61 = vadd.f32 %v2368_v41, %v2294_v48 }
 0x319   :  { %v2439_v51 = vpop.f32.mrf.mxu1 }
 0x31a   :  { %v2446_v27 = vmax.f32 %v2442_v5, 0.0  ;;  %v2444_v34 = vadd.f32 %v2438_v54, %v2284_v53  ;;  %v2443_v46 = vadd.f32 %v2369_v61, %v2283_v60  ;;  %v2440_v56 = vadd.f32 %v2439_v51, %v2294_v48 }
 0x31c   :  { %2450 = vst [vmem:[%s3352_s6] sm:$0xff] %v2446_v27  ;;  %v2448_v36 = vmax.f32 %v2444_v34, 0.0  ;;  %v2447_v11 = vmax.f32 %v2443_v46, 0.0  ;;  %v2445_v15 = vadd.f32 %v2440_v56, %v2285_v63 }
 0x31e   :  { %2452 = vst [vmem:[%s3352_s6 + $0x10] sm:$0xff] %v2448_v36  ;;  %2451 = vst [vmem:[%s3352_s6 + $0x8] sm:$0xff] %v2447_v11  ;;  %v2449_v14 = vmax.f32 %v2445_v15, 0.0 }
 0x320   :  { %2453 = vst [vmem:[%s3352_s6 + $0x18] sm:$0xff] %v2449_v14 }

</bundles_post_ra>
